<compile_context>
chip_gen: v7x
topology: tpu7x:2x2x1
jax: 0.10.0
libtpu: 0.0.40
codegen_flags: <defaults>
</compile_context>

<pallas_src>
import functools

import jax
import jax.numpy as jnp
from jax.experimental import pallas as pl
from jax.experimental.pallas import tpu as pltpu

_LANE = 128      # lane width: last dim padded to a multiple of this
_SUBLANE = 8     # sublane width: second-to-last dim padded to a multiple of this


def _round_up(x, m):
    return ((x + m - 1) // m) * m


# ---------------------------------------------------------------------------
# Fused kernel
# ---------------------------------------------------------------------------
def _make_decoder_kernel(n_layers):
    """Kernel computing relu(...relu(relu(z@W0+b0)@W1+b1)...) fully in VMEM."""

    def kernel(z_ref, *refs):
        # refs = (w0, b0, w1, b1, ..., w_{L-1}, b_{L-1}, o_ref)
        o_ref = refs[-1]
        h = z_ref[...]                               # (M_pad, K0_pad) f32
        for i in range(n_layers):                    # statically unrolled
            w = refs[2 * i][...]                     # (Kin_pad, Kout_pad)
            b = refs[2 * i + 1][...]                 # (1, Kout_pad)
            acc = jnp.dot(h, w, preferred_element_type=jnp.float32)
            h = jnp.maximum(acc + b, 0.0)            # fused bias + ReLU epilogue
        o_ref[...] = h.astype(o_ref.dtype)           # lane-dense (M_pad, 128k) store

    return kernel


def _fused_decoder_call(z_pad, padded_params):
    """Single pallas_call over the padded decoder stack."""
    n_layers = len(padded_params)
    m_pad = z_pad.shape[0]
    n_last_pad = padded_params[-1][0].shape[1]

    flat_params = []
    for w, b in padded_params:
        flat_params.extend([w, b])

    # Advisory cost hint (padded shapes, f32).
    flops = 0
    bytes_accessed = z_pad.size * 4 + m_pad * n_last_pad * 4
    for w, b in padded_params:
        flops += 2 * m_pad * w.shape[0] * w.shape[1]
        bytes_accessed += (w.size + b.size) * 4

    kernel = _make_decoder_kernel(n_layers)
    n_inputs = 1 + 2 * n_layers

    return pl.pallas_call(
        kernel,
        out_shape=jax.ShapeDtypeStruct((m_pad, n_last_pad), jnp.float32),
        in_specs=[pl.BlockSpec(memory_space=pltpu.MemorySpace.VMEM)] * n_inputs,
        out_specs=pl.BlockSpec(memory_space=pltpu.MemorySpace.VMEM),
        cost_estimate=pl.CostEstimate(
            flops=flops, transcendentals=0, bytes_accessed=bytes_accessed),
    )(z_pad, *flat_params)


# ---------------------------------------------------------------------------
# Parameter handling
# ---------------------------------------------------------------------------
def init_decoder_params(key, latent_dim, n_neurons):
    """nn.Linear-style init; weights stored (in, out). Returns list[(w, b)]."""
    params = []
    n_in = latent_dim
    for n_out in n_neurons:
        key, kw, kb = jax.random.split(key, 3)
        bound = 1.0 / jnp.sqrt(jnp.float32(n_in))
        w = jax.random.uniform(kw, (n_in, n_out), jnp.float32, -bound, bound)
        b = jax.random.uniform(kb, (n_out,), jnp.float32, -bound, bound)
        params.append((w, b))
        n_in = n_out
    return params


def pad_decoder_params(params):
    """Zero-pad every layer to lane/sublane-friendly shapes. Done once."""
    padded = []
    for w, b in params:
        k_in, k_out = w.shape
        k_in_p = _round_up(k_in, _LANE)    # matches previous layer's padded width
        k_out_p = _round_up(k_out, _LANE)
        w_p = jnp.zeros((k_in_p, k_out_p), jnp.float32).at[:k_in, :k_out].set(w)
        b_p = jnp.zeros((1, k_out_p), jnp.float32).at[0, :k_out].set(b)
        padded.append((w_p, b_p))
    return tuple(padded)


# ---------------------------------------------------------------------------
# Forward passes
# ---------------------------------------------------------------------------
@functools.partial(jax.jit, static_argnames=("n_out_last",))
def decoder_forward(z, padded_params, *, n_out_last):
    batch, latent = z.shape
    m_pad = _round_up(batch, _SUBLANE)
    k_pad = padded_params[0][0].shape[0]
    z_pad = jnp.zeros((m_pad, k_pad), jnp.float32).at[:batch, :latent].set(z)
    out_pad = _fused_decoder_call(z_pad, padded_params)
    return out_pad[:batch, :n_out_last]


def decoder_reference(z, params):
    h = z
    for w, b in params:
        h = jnp.maximum(h @ w + b, 0.0)
    return h


# ---------------------------------------------------------------------------
if __name__ == "__main__":
    key = jax.random.PRNGKey(0)
    key, kz = jax.random.split(key)

    latent_dim = 8
    n_neurons = [32, 16]          # Decoder(latent_dim=8, n_neurons=[32, 16])
    batch = 2

    z = jax.random.normal(kz, (batch, latent_dim), jnp.float32)
    params = init_decoder_params(key, latent_dim, n_neurons)
    padded_params = pad_decoder_params(params)

    out = decoder_forward(z, padded_params, n_out_last=n_neurons[-1])
    out = jax.block_until_ready(out)

    ref = decoder_reference(z, params)
    assert out.shape == (batch, n_neurons[-1])
    assert jnp.allclose(out, ref, atol=1e-5, rtol=1e-5), "mismatch vs reference"

    print("KERNEL_OK")
</pallas_src>

<mosaic_0001>
module attributes {stable_mosaic.version = 11 : i64} {
  func.func @kernel(%arg0: memref<8x128xf32, #tpu.memory_space<vmem>>, %arg1: memref<128x128xf32, #tpu.memory_space<vmem>>, %arg2: memref<1x128xf32, #tpu.memory_space<vmem>>, %arg3: memref<128x128xf32, #tpu.memory_space<vmem>>, %arg4: memref<1x128xf32, #tpu.memory_space<vmem>>, %arg5: memref<8x128xf32, #tpu.memory_space<vmem>>) attributes {dimension_semantics = [], scalar_prefetch = 0 : i64, scratch_operands = 0 : i64, tpu.core_type = #tpu.core_type<tc>} {
    %c0 = arith.constant 0 : index
    %c0_0 = arith.constant 0 : index
    %0 = vector.load %arg0[%c0, %c0_0] : memref<8x128xf32, #tpu.memory_space<vmem>>, vector<8x128xf32>
    %c0_1 = arith.constant 0 : index
    %c0_2 = arith.constant 0 : index
    %1 = vector.load %arg1[%c0_1, %c0_2] : memref<128x128xf32, #tpu.memory_space<vmem>>, vector<128x128xf32>
    %c0_3 = arith.constant 0 : index
    %c0_4 = arith.constant 0 : index
    %2 = vector.load %arg2[%c0_3, %c0_4] : memref<1x128xf32, #tpu.memory_space<vmem>>, vector<1x128xf32>
    %cst = arith.constant dense<0.000000e+00> : vector<8x128xf32>
    %3 = tpu.matmul %0, %1, %cst {dimension_numbers = #tpu.dot_dimension_numbers<[1], [0], [0], [1], [0, 0, 1, 1], [], []>} : vector<8x128xf32>, vector<128x128xf32>, vector<8x128xf32> -> vector<8x128xf32>
    %4 = vector.broadcast %2 : vector<1x128xf32> to vector<8x128xf32>
    %5 = arith.addf %3, %4 : vector<8x128xf32>
    %cst_5 = arith.constant 0.000000e+00 : f32
    %6 = vector.broadcast %cst_5 : f32 to vector<8x128xf32>
    %7 = arith.maximumf %5, %6 : vector<8x128xf32>
    %c0_6 = arith.constant 0 : index
    %c0_7 = arith.constant 0 : index
    %8 = vector.load %arg3[%c0_6, %c0_7] : memref<128x128xf32, #tpu.memory_space<vmem>>, vector<128x128xf32>
    %c0_8 = arith.constant 0 : index
    %c0_9 = arith.constant 0 : index
    %9 = vector.load %arg4[%c0_8, %c0_9] : memref<1x128xf32, #tpu.memory_space<vmem>>, vector<1x128xf32>
    %cst_10 = arith.constant dense<0.000000e+00> : vector<8x128xf32>
    %10 = tpu.matmul %7, %8, %cst_10 {dimension_numbers = #tpu.dot_dimension_numbers<[1], [0], [0], [1], [0, 0, 1, 1], [], []>} : vector<8x128xf32>, vector<128x128xf32>, vector<8x128xf32> -> vector<8x128xf32>
    %11 = vector.broadcast %9 : vector<1x128xf32> to vector<8x128xf32>
    %12 = arith.addf %10, %11 : vector<8x128xf32>
    %cst_11 = arith.constant 0.000000e+00 : f32
    %13 = vector.broadcast %cst_11 : f32 to vector<8x128xf32>
    %14 = arith.maximumf %12, %13 : vector<8x128xf32>
    %c0_12 = arith.constant 0 : index
    %c0_13 = arith.constant 0 : index
    %15 = vector.load %arg5[%c0_12, %c0_13] : memref<8x128xf32, #tpu.memory_space<vmem>>, vector<8x128xf32>
    tpu.vector_store %arg5[%c0_12, %c0_13], %14 {strides = array<i32>} : memref<8x128xf32, #tpu.memory_space<vmem>>, vector<8x128xf32>,
    return
  }
}

</mosaic_0001>

<bundles_post_ra>
// kernel: decoder_forward.1
= control target key start
LH: loop header
LB: loop body
LE: loop exit
PB: predicated region body
PF: predicated region fallthrough
CT: control target
= control target key end

     0   :  { %10 = vsyncpa [#allocation3], 0  ;;  %s542_s0 = inlined_call_operand.vmem [shape: f32[8,128], index: 0, kind: input, shape index: {}]   ;;  %s543_s1 = inlined_call_operand.hbm [shape: f32[128,128], index: 1, kind: input, shape index: {}]   ;;  %s544_s2 = inlined_call_operand.vmem [shape: f32[1,128], index: 2, kind: input, shape index: {}]   ;;  %s545_s3 = inlined_call_operand.hbm [shape: f32[128,128], index: 3, kind: input, shape index: {}]   ;;  %s546_s4 = inlined_call_operand.vmem [shape: f32[1,128], index: 4, kind: input, shape index: {}]   ;;  %s547_s5 = inlined_call_operand.vmem [shape: f32[8,128], index: 5, kind: output, shape index: {}]  }
   0x1   :  { %11 = vsyncpa [#allocation5], 0  ;;  %s453_s18 = smov [#allocation2]   ;;  %s405_s22 = scalar_lea.hbm %s543_s1, 2048 }
   0x2   :  { %s19_s19 = sshll.u32 %s453_s18, 4  ;;  %p406_p0 = scmp.ne.s32.totalorder %s543_s1, %s405_s22  ;;  %s20_s19 = int_to_ptr.vmem [resolvable:$true] %s19_s19 }
   0x3   :  { %p409_p1 = scmp.lt.u32.totalorder %s405_s22, %s543_s1 }
   0x5   :  { %p411_p2 = pnand %p409_p1, %p406_p0 }
   0x7   :  { %414 = shalt.err (!%p411_p2)
}
   0x8   :  { %s415_s27 = scalar_lea.vmem %s20_s19, 2048  ;;  %p420_p4 = scmp.lt.s32.totalorder %s20_s19, %s20_s19 }
   0x9   :  { %p416_p3 = scmp.ne.s32.totalorder %s20_s19, %s415_s27  ;;  %p421_p5 = scmp.lt.s32.totalorder %s415_s27, %s415_s27 }
   0xb   :  { %p422_p6 = por %p421_p5, %p420_p4 }
   0xd   :  { %p423_p7 = pnand %p422_p6, %p416_p3 }
   0xf   :  { %426 = shalt.err (!%p423_p7)
}
  0x10   :  { %s454_s28 = smov 128   ;;  %s455_s29 = smov 8  }
  0x11   :  { %25 = dma.hbm_to_vmem [thread:$0]  %s543_s1, 2048, %s20_s19, [#allocation3], %s454_s28, %s454_s28, %s455_s29  }
  0x12   :  { %s456_s7 = smov [#allocation4]   ;;  %s427_s11 = scalar_lea.hbm %s545_s3, 2048 }
  0x13   :  { %s33_s8 = sshll.u32 %s456_s7, 4  ;;  %p428_p8 = scmp.ne.s32.totalorder %s545_s3, %s427_s11  ;;  %s34_s8 = int_to_ptr.vmem [resolvable:$true] %s33_s8 }
  0x14   :  { %p431_p9 = scmp.lt.u32.totalorder %s427_s11, %s545_s3 }
  0x16   :  { %p433_p10 = pnand %p431_p9, %p428_p8 }
  0x18   :  { %436 = shalt.err (!%p433_p10)
}
  0x19   :  { %s437_s16 = scalar_lea.vmem %s34_s8, 2048  ;;  %p442_p12 = scmp.lt.s32.totalorder %s34_s8, %s34_s8 }
  0x1a   :  { %p438_p11 = scmp.ne.s32.totalorder %s34_s8, %s437_s16  ;;  %p443_p13 = scmp.lt.s32.totalorder %s437_s16, %s437_s16 }
  0x1c   :  { %p444_p0 = por %p443_p13, %p442_p12 }
  0x1e   :  { %p445_p1 = pnand %p444_p0, %p438_p11 }
  0x20   :  { %448 = shalt.err (!%p445_p1)
}
  0x21   :  { %39 = dma.hbm_to_vmem [thread:$0]  %s545_s3, 2048, %s34_s8, [#allocation5], %s454_s28, %s454_s28, %s455_s29  }
  0x22   :  { %449 = dma.done.wait [#allocation3], 2048  }
  0x23   :  { %450 = vsyncadd [#allocation3], 4294965248 }
  0x24   :  { %451 = dma.done.wait [#allocation5], 2048  }
  0x25   :  { %452 = vsyncadd [#allocation5], 4294965248  ;;  %v457_v0 = vmov 0.0|0.0   ;;  %vm458_vm0 = vmmov 0   ;;  %v459_v1 = vmov 0.0   ;;  %v49_v2 = vld [vmem:[#allocation2] sm:$0xff] }
  0x26   :  { %350 = vmatprep.subr.bf16.mxu0 %v457_v0  ;;  %312 = vmatprep.mubr.msk.f32.mxu0 %vm458_vm0, %v459_v1  ;;  %v50_v3 = vld [vmem:[#allocation2 + $0x8] sm:$0xff]  ;;  %v51_v4 = vld [vmem:[#allocation2 + $0x10] sm:$0xff]  ;;  %v52_v6 = vld [vmem:[#allocation2 + $0x18] sm:$0xff] }
  0x27   :  { %374 = vmatprep.subr.bf16.mxu1 %v457_v0  ;;  %347 = vmatprep.mubr.msk.f32.mxu1 %vm458_vm0, %v459_v1  ;;  %v351_v5 = vpack.c.bf16 %v50_v3, %v49_v2  ;;  %v354_v7 = vpack.c.bf16 %v52_v6, %v51_v4  ;;  %v53_v8 = vld [vmem:[#allocation2 + $0x20] sm:$0xff]  ;;  %v54_v9 = vld [vmem:[#allocation2 + $0x28] sm:$0xff]  ;;  %v145_v12 = vld [vmem:[#allocation4 + $0x10] sm:$0xff] }
  0x28   :  { %v143_v10 = vld [vmem:[#allocation4] sm:$0xff]  ;;  %v144_v11 = vld [vmem:[#allocation4 + $0x8] sm:$0xff]  ;;  %v146_v13 = vld [vmem:[#allocation4 + $0x18] sm:$0xff]  ;;  %v357_v14 = vpack.c.bf16 %v54_v9, %v53_v8 }
  0x29   :  { %352 = vmatpush3.bf16.msra.mxu0 %v351_v5  ;;  %v375_v15 = vpack.c.bf16 %v144_v11, %v143_v10  ;;  %v55_v16 = vld [vmem:[#allocation2 + $0x30] sm:$0xff]  ;;  %v56_v17 = vld [vmem:[#allocation2 + $0x38] sm:$0xff]  ;;  %v378_v18 = vpack.c.bf16 %v146_v13, %v145_v12  ;;  %v147_v19 = vld [vmem:[#allocation4 + $0x20] sm:$0xff] }
  0x2a   :  { %353 = vmatprep.subr.bf16.mxu0 %v457_v0  ;;  %v148_v20 = vld [vmem:[#allocation4 + $0x28] sm:$0xff]  ;;  %v360_v21 = vpack.c.bf16 %v56_v17, %v55_v16  ;;  %v57_v22 = vld [vmem:[#allocation2 + $0x40] sm:$0xff]  ;;  %v149_v25 = vld [vmem:[#allocation4 + $0x30] sm:$0xff] }
  0x2b   :  { %376 = vmatpush3.bf16.msra.mxu1 %v375_v15  ;;  %v58_v23 = vld [vmem:[#allocation2 + $0x48] sm:$0xff]  ;;  %v381_v24 = vpack.c.bf16 %v148_v20, %v147_v19  ;;  %v150_v26 = vld [vmem:[#allocation4 + $0x38] sm:$0xff]  ;;  %v59_v28 = vld [vmem:[#allocation2 + $0x50] sm:$0xff] }
  0x2c   :  { %377 = vmatprep.subr.bf16.mxu1 %v457_v0  ;;  %v363_v27 = vpack.c.bf16 %v58_v23, %v57_v22  ;;  %v60_v29 = vld [vmem:[#allocation2 + $0x58] sm:$0xff]  ;;  %v384_v30 = vpack.c.bf16 %v150_v26, %v149_v25  ;;  %v151_v31 = vld [vmem:[#allocation4 + $0x40] sm:$0xff]  ;;  %v152_v32 = vld [vmem:[#allocation4 + $0x48] sm:$0xff] }
  0x2d   :  { %355 = vmatpush3.bf16.msra.mxu0 %v354_v7  ;;  %v366_v33 = vpack.c.bf16 %v60_v29, %v59_v28  ;;  %v61_v34 = vld [vmem:[#allocation2 + $0x60] sm:$0xff]  ;;  %v62_v35 = vld [vmem:[#allocation2 + $0x68] sm:$0xff]  ;;  %v387_v36 = vpack.c.bf16 %v152_v32, %v151_v31  ;;  %v153_v37 = vld [vmem:[#allocation4 + $0x50] sm:$0xff] }
  0x2e   :  { %356 = vmatprep.subr.bf16.mxu0 %v457_v0  ;;  %v154_v38 = vld [vmem:[#allocation4 + $0x58] sm:$0xff]  ;;  %v369_v39 = vpack.c.bf16 %v62_v35, %v61_v34  ;;  %v63_v40 = vld [vmem:[#allocation2 + $0x70] sm:$0xff]  ;;  %v155_v43 = vld [vmem:[#allocation4 + $0x60] sm:$0xff] }
  0x2f   :  { %379 = vmatpush3.bf16.msra.mxu1 %v378_v18  ;;  %v64_v41 = vld [vmem:[#allocation2 + $0x78] sm:$0xff]  ;;  %v390_v42 = vpack.c.bf16 %v154_v38, %v153_v37  ;;  %v156_v44 = vld [vmem:[#allocation4 + $0x68] sm:$0xff]  ;;  %v48_v47 = vld [vmem:[%s542_s0] sm:$0xff] }
  0x30   :  { %380 = vmatprep.subr.bf16.mxu1 %v457_v0  ;;  %v372_v45 = vpack.c.bf16 %v64_v41, %v63_v40  ;;  %v393_v46 = vpack.c.bf16 %v156_v44, %v155_v43  ;;  %v157_v48 = vld [vmem:[#allocation4 + $0x70] sm:$0xff]  ;;  %v158_v49 = vld [vmem:[#allocation4 + $0x78] sm:$0xff]  ;;  %v244_v51 = vld [vmem:[%s544_s2] ss:$0 sm:$0xff] }
  0x31   :  { %358 = vmatpush3.bf16.msra.mxu0 %v357_v14  ;;  %v396_v50 = vpack.c.bf16 %v158_v49, %v157_v48  ;;  %v245_v56 = vld [vmem:[%s546_s4] ss:$0 sm:$0xff] }
  0x32   :  { %359 = vmatprep.subr.bf16.mxu0 %v457_v0 }
  0x33   :  { %382 = vmatpush3.bf16.msra.mxu1 %v381_v24 }
  0x34   :  { %383 = vmatprep.subr.bf16.mxu1 %v457_v0 }
  0x35   :  { %361 = vmatpush3.bf16.msra.mxu0 %v360_v21 }
  0x36   :  { %362 = vmatprep.subr.bf16.mxu0 %v457_v0 }
  0x37   :  { %385 = vmatpush3.bf16.msra.mxu1 %v384_v30 }
  0x38   :  { %386 = vmatprep.subr.bf16.mxu1 %v457_v0 }
  0x39   :  { %364 = vmatpush3.bf16.msra.mxu0 %v363_v27 }
  0x3a   :  { %365 = vmatprep.subr.bf16.mxu0 %v457_v0 }
  0x3b   :  { %388 = vmatpush3.bf16.msra.mxu1 %v387_v36 }
  0x3c   :  { %389 = vmatprep.subr.bf16.mxu1 %v457_v0 }
  0x3d   :  { %367 = vmatpush3.bf16.msra.mxu0 %v366_v33 }
  0x3e   :  { %368 = vmatprep.subr.bf16.mxu0 %v457_v0 }
  0x3f   :  { %391 = vmatpush3.bf16.msra.mxu1 %v390_v42 }
  0x40   :  { %392 = vmatprep.subr.bf16.mxu1 %v457_v0 }
  0x41   :  { %370 = vmatpush3.bf16.msra.mxu0 %v369_v39 }
  0x42   :  { %371 = vmatprep.subr.bf16.mxu0 %v457_v0 }
  0x43   :  { %394 = vmatpush3.bf16.msra.mxu1 %v393_v46 }
  0x44   :  { %395 = vmatprep.subr.bf16.mxu1 %v457_v0 }
  0x45   :  { %373 = vmatpush3.bf16.msra.mxu0 %v372_v45 }
  0x47   :  { %397 = vmatpush3.bf16.msra.mxu1 %v396_v50 }
  0x48   :  { %313 = vmatmul.mubr.f32.vlgmr.msra.gmra.mrb[0].mxu0 %v48_v47 }
 0x11b   :  { %v138_v52 = vpop.f32.mrb[0].mxu0 }
 0x11c   :  { %v139_v53 = vadd.f32 %v244_v51, %v138_v52  ;;  %v314_v54 = vpop.f32.mrb[1].mxu0 }
 0x11e   :  { %v142_v55 = vmax.f32 %v139_v53, 0.0 }
 0x120   :  { %348 = vmatmul.mubr.f32.vlgmr.msra.gmra.mrb[0].mxu1 %v142_v55 }
 0x1f3   :  { %v232_v57 = vpop.f32.mrb[0].mxu1 }
 0x1f4   :  { %v233_v58 = vadd.f32 %v245_v56, %v232_v57  ;;  %v349_v59 = vpop.f32.mrb[1].mxu1 }
 0x1f6   :  { %v236_v60 = vmax.f32 %v233_v58, 0.0 }
 0x1f8   :  { %237 = vst [vmem:[%s547_s5] sm:$0xff] %v236_v60 }
 0x1f9   :  { %242 = vsyncpa [#allocation3], 1 }
 0x1fa   :  { %243 = vsyncpa [#allocation5], 1 }

</bundles_post_ra>
